<compile_context>
chip_gen: v6e
topology: v6e:2x2x1
jax: 0.10.0
libtpu: 0.0.40
codegen_flags: <defaults>
</compile_context>

<pallas_src>
import functools
import math

import jax
import jax.numpy as jnp
from jax.experimental import pallas as pl
from jax.experimental.pallas import tpu as pltpu

_EPS = 1e-12  # F.normalize default eps


def _loss_kernel(x_ref, y_ref, o_ref, *, n_total, tile_batch):
    """Writes this tile's partial sum of cos(x_i, y_i) into its output block."""
    i = pl.program_id(0)

    x = x_ref[...].astype(jnp.float32)
    y = y_ref[...].astype(jnp.float32)

    # Row-wise dot product and L2 norms (reductions over the lane axis).
    dot = jnp.sum(x * y, axis=-1, keepdims=True)            # [tb, 1]
    nx = jnp.sqrt(jnp.sum(x * x, axis=-1, keepdims=True))   # [tb, 1]
    ny = jnp.sqrt(jnp.sum(y * y, axis=-1, keepdims=True))   # [tb, 1]

    # F.normalize semantics: clamp each norm with max(||.||, eps) BEFORE dividing.
    denom = jnp.maximum(nx, _EPS) * jnp.maximum(ny, _EPS)
    cos = dot / denom                                        # per-row only (cheap)

    # Mask rows of the (possibly) partial last tile.
    row = i * tile_batch + jax.lax.broadcasted_iota(jnp.int32, (tile_batch, 1), 0)
    cos = jnp.where(row < n_total, cos, 0.0)

    partial = jnp.sum(cos)
    # Lane-dense output block; wrapper reads element [0, 0] of each block.
    o_ref[...] = jnp.full((8, 128), partial, dtype=jnp.float32)


def _pick_tile_batch(n, d):
    """Largest row tile s.t. 2 inputs x 2 buffers x tile x d x 4B fits ~24 MiB."""
    budget = 24 * 1024 * 1024          # safe on v7x (64 MiB physical VMEM) too
    per_row = 2 * 2 * d * 4            # conservative: f32 element size
    tb = max(8, min(int(budget // per_row), 2048))
    tb = (tb // 8) * 8                 # sublane multiple
    n_pad = ((n + 7) // 8) * 8
    return min(tb, n_pad)


def loss_fn(x, y, *, tile_batch=None):
    """Pallas implementation of Loss_Fn.forward for inputs of shape [..., D]."""
    assert x.shape == y.shape and x.ndim >= 1
    d = x.shape[-1]
    n = int(math.prod(x.shape[:-1])) if x.ndim > 1 else 1
    x2 = x.reshape(n, d)
    y2 = y.reshape(n, d)

    if tile_batch is None:
        tb = _pick_tile_batch(n, d)
    else:
        tb = max(8, (int(tile_batch) // 8) * 8)
        tb = min(tb, ((n + 7) // 8) * 8)
    num_tiles = (n + tb - 1) // tb

    kernel = functools.partial(_loss_kernel, n_total=n, tile_batch=tb)

    itemsize = jnp.dtype(x.dtype).itemsize
    cost = pl.CostEstimate(
        flops=6 * n * d,
        transcendentals=0,
        bytes_accessed=2 * n * d * itemsize + num_tiles * 8 * 128 * 4,
    )

    out = pl.pallas_call(
        kernel,
        out_shape=jax.ShapeDtypeStruct((num_tiles * 8, 128), jnp.float32),
        grid_spec=pltpu.PrefetchScalarGridSpec(
            num_scalar_prefetch=0,
            grid=(num_tiles,),
            in_specs=[
                pl.BlockSpec((tb, d), lambda i: (i, 0)),
                pl.BlockSpec((tb, d), lambda i: (i, 0)),
            ],
            out_specs=pl.BlockSpec((8, 128), lambda i: (i, 0)),
        ),
        compiler_params=pltpu.CompilerParams(
            dimension_semantics=("parallel",),
            vmem_limit_bytes=48 * 1024 * 1024,
        ),
        cost_estimate=cost,
    )(x2, y2)

    partials = out[::8, 0]                       # one partial sum per grid step
    total_cos = jnp.sum(partials)
    return 2.0 - 2.0 * (total_cos / jnp.float32(n))


def _reference(x, y):
    xn = x / jnp.maximum(jnp.linalg.norm(x, axis=-1, keepdims=True), _EPS)
    yn = y / jnp.maximum(jnp.linalg.norm(y, axis=-1, keepdims=True), _EPS)
    return jnp.mean(2.0 - 2.0 * jnp.sum(xn * yn, axis=-1))


if __name__ == "__main__":
    key = jax.random.PRNGKey(0)
    kx1, ky1, kx2, ky2 = jax.random.split(key, 4)

    # Case 1: small 2-D input, feature dim on the lane axis (auto tile size).
    x1 = jax.random.normal(kx1, (16, 128), dtype=jnp.float32)
    y1 = jax.random.normal(ky1, (16, 128), dtype=jnp.float32)
    out1 = jax.block_until_ready(loss_fn(x1, y1))
    ref1 = _reference(x1, y1)
    assert jnp.allclose(out1, ref1, atol=1e-5, rtol=1e-5), (out1, ref1)

    # Case 2: 3-D input, multiple grid steps, masked (non-divisible) last tile.
    x2 = jax.random.normal(kx2, (2, 13, 96), dtype=jnp.float32)
    y2 = jax.random.normal(ky2, (2, 13, 96), dtype=jnp.float32)
    out2 = jax.block_until_ready(loss_fn(x2, y2, tile_batch=8))
    ref2 = _reference(x2, y2)
    assert jnp.allclose(out2, ref2, atol=1e-5, rtol=1e-5), (out2, ref2)

    print("KERNEL_OK")
</pallas_src>

<mosaic_0001>
module attributes {stable_mosaic.version = 11 : i64} {
  func.func @_loss_kernel(%arg0: i32, %arg1: memref<16x128xf32, #tpu.memory_space<vmem>>, %arg2: memref<16x128xf32, #tpu.memory_space<vmem>>, %arg3: memref<8x128xf32, #tpu.memory_space<vmem>>) attributes {dimension_semantics = [#tpu.dimension_semantics<parallel>], iteration_bounds = array<i64: 1>, scalar_prefetch = 0 : i64, scratch_operands = 0 : i64, tpu.core_type = #tpu.core_type<tc>, window_params = [{transform_indices = @transform_0, window_bounds = array<i64: 16, 128>}, {transform_indices = @transform_1, window_bounds = array<i64: 16, 128>}, {transform_indices = @transform_2, window_bounds = array<i64: 8, 128>}]} {
    %c0 = arith.constant 0 : index
    %c0_0 = arith.constant 0 : index
    %0 = vector.load %arg1[%c0, %c0_0] : memref<16x128xf32, #tpu.memory_space<vmem>>, vector<16x128xf32>
    %c0_1 = arith.constant 0 : index
    %c0_2 = arith.constant 0 : index
    %1 = vector.load %arg2[%c0_1, %c0_2] : memref<16x128xf32, #tpu.memory_space<vmem>>, vector<16x128xf32>
    %2 = arith.mulf %0, %1 : vector<16x128xf32>
    %cst = arith.constant dense<0.000000e+00> : vector<16xf32>
    %3 = vector.multi_reduction <add>, %2, %cst [1] : vector<16x128xf32> to vector<16xf32>
    %4 = vector.shape_cast %3 : vector<16xf32> to vector<16x1xf32>
    %5 = arith.mulf %0, %0 : vector<16x128xf32>
    %cst_3 = arith.constant dense<0.000000e+00> : vector<16xf32>
    %6 = vector.multi_reduction <add>, %5, %cst_3 [1] : vector<16x128xf32> to vector<16xf32>
    %7 = vector.shape_cast %6 : vector<16xf32> to vector<16x1xf32>
    %8 = math.sqrt %7 : vector<16x1xf32>
    %9 = arith.mulf %1, %1 : vector<16x128xf32>
    %cst_4 = arith.constant dense<0.000000e+00> : vector<16xf32>
    %10 = vector.multi_reduction <add>, %9, %cst_4 [1] : vector<16x128xf32> to vector<16xf32>
    %11 = vector.shape_cast %10 : vector<16xf32> to vector<16x1xf32>
    %12 = math.sqrt %11 : vector<16x1xf32>
    %cst_5 = arith.constant 9.99999996E-13 : f32
    %13 = vector.broadcast %cst_5 : f32 to vector<16x1xf32>
    %14 = arith.maximumf %8, %13 : vector<16x1xf32>
    %cst_6 = arith.constant 9.99999996E-13 : f32
    %15 = vector.broadcast %cst_6 : f32 to vector<16x1xf32>
    %16 = arith.maximumf %12, %15 : vector<16x1xf32>
    %17 = arith.mulf %14, %16 : vector<16x1xf32>
    %18 = arith.divf %4, %17 : vector<16x1xf32>
    %c16_i32 = arith.constant 16 : i32
    %19 = arith.muli %arg0, %c16_i32 : i32
    %20 = tpu.iota {dimensions = array<i32: 0>} : vector<16x1xi32>
    %21 = vector.broadcast %19 : i32 to vector<16x1xi32>
    %22 = arith.addi %21, %20 : vector<16x1xi32>
    %c16_i32_7 = arith.constant 16 : i32
    %23 = vector.broadcast %c16_i32_7 : i32 to vector<16x1xi32>
    %24 = arith.cmpi slt, %22, %23 : vector<16x1xi32>
    %cst_8 = arith.constant 0.000000e+00 : f32
    %25 = vector.broadcast %cst_8 : f32 to vector<16x1xf32>
    %26 = arith.select %24, %18, %25 : vector<16x1xi1>, vector<16x1xf32>
    %27 = vector.shape_cast %26 : vector<16x1xf32> to vector<1x16x1xf32>
    %cst_9 = arith.constant dense<0.000000e+00> : vector<1xf32>
    %28 = vector.multi_reduction <add>, %27, %cst_9 [1, 2] : vector<1x16x1xf32> to vector<1xf32>
    %29 = vector.shape_cast %28 : vector<1xf32> to vector<1x1x1xf32>
    %30 = vector.extract %29[0, 0, 0] : f32 from vector<1x1x1xf32>
    %31 = vector.broadcast %30 : f32 to vector<8x128xf32>
    %c0_10 = arith.constant 0 : index
    %c0_11 = arith.constant 0 : index
    %32 = vector.load %arg3[%c0_10, %c0_11] : memref<8x128xf32, #tpu.memory_space<vmem>>, vector<8x128xf32>
    tpu.vector_store %arg3[%c0_10, %c0_11], %31 {strides = array<i32>} : memref<8x128xf32, #tpu.memory_space<vmem>>, vector<8x128xf32>,
    return
  }
  func.func @transform_0(%arg0: i32) -> (i32, i32) {
    %c0_i32 = arith.constant 0 : i32
    %c0_i32_0 = arith.constant 0 : i32
    return %arg0, %c0_i32 : i32, i32
  }
  func.func @transform_1(%arg0: i32) -> (i32, i32) {
    %c0_i32 = arith.constant 0 : i32
    %c0_i32_0 = arith.constant 0 : i32
    return %arg0, %c0_i32 : i32, i32
  }
  func.func @transform_2(%arg0: i32) -> (i32, i32) {
    %c0_i32 = arith.constant 0 : i32
    %c0_i32_0 = arith.constant 0 : i32
    return %arg0, %c0_i32 : i32, i32
  }
}

</mosaic_0001>

<bundles_post_ra>
// kernel: tpu_custom_call.1
= control target key start
LH: loop header
LB: loop body
LE: loop exit
PB: predicated region body
PF: predicated region fallthrough
CT: control target
= control target key end

     0   :  { %7 = vsyncpa [#allocation3], 0  ;;  %s256_s0 = inlined_call_operand.hbm [shape: f32[16,128], index: 0, kind: input, shape index: {}]   ;;  %s257_s1 = inlined_call_operand.hbm [shape: f32[16,128], index: 1, kind: input, shape index: {}]   ;;  %s258_s2 = inlined_call_operand.hbm [shape: f32[8,128], index: 2, kind: output, shape index: {}]  }
   0x1   :  { %8 = vsyncpa [#allocation6], 0 }
   0x2   :  { %9 = vsyncpa [#allocation4], 0  ;;  %s227_s9 = smov [#allocation2]  }
   0x3   :  { %s15_s10 = sshll.u32 %s227_s9, 4  ;;  %s16_s10 = int_to_ptr.vmem [resolvable:$true] %s15_s10 }
   0x4   :  { %s169_s11 = scalar_lea.vmem %s16_s10, 256  ;;  %p174_p1 = scmp.lt.s32.totalorder %s16_s10, %s16_s10 }
   0x5   :  { %p170_p0 = scmp.ne.s32.totalorder %s16_s10, %s169_s11  ;;  %p175_p2 = scmp.lt.s32.totalorder %s169_s11, %s169_s11 }
   0x7   :  { %p176_p3 = por %p175_p2, %p174_p1 }
   0x9   :  { %p177_p4 = pnand %p176_p3, %p170_p0 }
   0xb   :  { %180 = shalt.err (!%p177_p4)
}
   0xc   :  { %s228_s12 = smov 128   ;;  %s229_s13 = smov 8  }
   0xd   :  { %21 = dma.hbm_to_vmem [thread:$0]  %s256_s0, 256, %s16_s10, [#allocation3], %s228_s12, %s228_s12, %s229_s13  }
   0xe   :  { %s230_s16 = smov [#allocation5]  }
   0xf   :  { %s27_s17 = sshll.u32 %s230_s16, 4  ;;  %s28_s17 = int_to_ptr.vmem [resolvable:$true] %s27_s17 }
  0x10   :  { %s189_s18 = scalar_lea.vmem %s28_s17, 256  ;;  %p194_p6 = scmp.lt.s32.totalorder %s28_s17, %s28_s17 }
  0x11   :  { %p190_p5 = scmp.ne.s32.totalorder %s28_s17, %s189_s18  ;;  %p195_p7 = scmp.lt.s32.totalorder %s189_s18, %s189_s18 }
  0x13   :  { %p196_p8 = por %p195_p7, %p194_p6 }
  0x15   :  { %p197_p9 = pnand %p196_p8, %p190_p5 }
  0x17   :  { %200 = shalt.err (!%p197_p9)
}
  0x18   :  { %33 = dma.hbm_to_vmem [thread:$0]  %s257_s1, 256, %s28_s17, [#allocation6], %s228_s12, %s228_s12, %s229_s13  }
  0x19   :  { %221 = dma.done.wait [#allocation3], 256  }
  0x1a   :  { %222 = vsyncadd [#allocation3], 4294967040 }
  0x1b   :  { %223 = dma.done.wait [#allocation6], 256  }
  0x1c   :  { %224 = vsyncadd [#allocation6], 4294967040  ;;  %v42_v0 = vld [vmem:[#allocation5] sm:$0xff]  ;;  %v40_v1 = vld [vmem:[#allocation2] sm:$0xff]  ;;  %vm111_vm8 = vcmask 7168   ;;  %s231_s0 = smov [#allocation7]  }
  0x1d   :  { %v43_v2 = vld [vmem:[#allocation5 + $0x8] sm:$0xff]  ;;  %v70_v3 = vmul.f32 %v42_v0, %v42_v0  ;;  %v50_v4 = vmul.f32 %v40_v1, %v40_v1  ;;  %v41_v5 = vld [vmem:[#allocation2 + $0x8] sm:$0xff]  ;;  %v44_v8 = vmul.f32 %v42_v0, %v40_v1  ;;  %s132_s1 = sshll.u32 %s231_s0, 4  ;;  %s133_s1 = int_to_ptr.vmem [resolvable:$true] %s132_s1 }
  0x1e   :  { %v71_v6 = vmul.f32 %v43_v2, %v43_v2  ;;  %v51_v7 = vmul.f32 %v41_v5, %v41_v5  ;;  %v45_v9 = vmul.f32 %v43_v2, %v41_v5  ;;  %s201_s22 = scalar_lea.vmem %s133_s1, 128  ;;  %p206_p11 = scmp.lt.s32.totalorder %s133_s1, %s133_s1 }
  0x1f   :  { %72 = vadd.xlane.f32.xlu1 %v70_v3  ;;  %52 = vadd.xlane.f32.xlu0 %v50_v4  ;;  %p202_p10 = scmp.ne.s32.totalorder %s133_s1, %s201_s22  ;;  %p207_p12 = scmp.lt.s32.totalorder %s201_s22, %s201_s22 }
  0x21   :  { %p208_p13 = por %p207_p12, %p206_p11 }
  0x23   :  { %74 = vadd.xlane.f32.xlu1 %v71_v6  ;;  %54 = vadd.xlane.f32.xlu0 %v51_v7  ;;  %p209_p0 = pnand %p208_p13, %p202_p10 }
  0x27   :  { %46 = vadd.xlane.f32.xlu0 %v44_v8  ;;  %48 = vadd.xlane.f32.xlu1 %v45_v9 }
  0xa8   :  { %v73_v10 = vpop.xlane.xlu1 %72  ;;  %v53_v11 = vpop.xlane.xlu0 %52 }
  0xa9   :  { %149 = vrsqrt.f32 %v73_v10  ;;  %vm78_vm0 = vcmp.eq.f32.partialorder %v73_v10, inf  ;;  %v81_v17 = vand.u32 2147483648, %v73_v10  ;;  %vm80_vm1 = vcmp.eq.f32.partialorder %v73_v10, 0.0 }
  0xaa   :  { %151 = vrsqrt.f32 %v53_v11  ;;  %vm58_vm2 = vcmp.eq.f32.partialorder %v53_v11, inf  ;;  %v61_v20 = vand.u32 2147483648, %v53_v11  ;;  %vm60_vm3 = vcmp.eq.f32.partialorder %v53_v11, 0.0 }
  0xac   :  { %v75_v12 = vpop.xlane.xlu1 %74  ;;  %v55_v13 = vpop.xlane.xlu0 %54 }
  0xad   :  { %153 = vrsqrt.f32 %v75_v12  ;;  %vm85_vm4 = vcmp.eq.f32.partialorder %v75_v12, inf  ;;  %v88_v29 = vand.u32 2147483648, %v75_v12  ;;  %vm87_vm5 = vcmp.eq.f32.partialorder %v75_v12, 0.0 }
  0xae   :  { %155 = vrsqrt.f32 %v55_v13  ;;  %vm65_vm6 = vcmp.eq.f32.partialorder %v55_v13, inf  ;;  %v68_v32 = vand.u32 2147483648, %v55_v13  ;;  %vm67_vm7 = vcmp.eq.f32.partialorder %v55_v13, 0.0 }
  0xb0   :  { %v47_v41 = vpop.xlane.xlu0 %46  ;;  %v49_v42 = vpop.xlane.xlu1 %48 }
  0xb6   :  { %v150_v14 = vpop.eup %149 }
  0xb7   :  { %v152_v15 = vpop.eup %151  ;;  %v77_v16 = vmul.f32 %v150_v14, %v73_v10 }
  0xb8   :  { %v57_v18 = vmul.f32 %v152_v15, %v53_v11 }
  0xb9   :  { %v79_v19 = vsel %vm78_vm0, %v73_v10, %v77_v16 }
  0xba   :  { %v154_v21 = vpop.eup %153  ;;  %v82_v22 = vsel %vm80_vm1, %v81_v17, %v79_v19  ;;  %v59_v23 = vsel %vm58_vm2, %v53_v11, %v57_v18 }
  0xbb   :  { %v156_v24 = vpop.eup %155  ;;  %v92_v25 = vmax.f32 %v82_v22, 1e-12  ;;  %v62_v26 = vsel %vm60_vm3, %v61_v20, %v59_v23  ;;  %v84_v27 = vmul.f32 %v154_v21, %v75_v12 }
  0xbc   :  { %v90_v28 = vmax.f32 %v62_v26, 1e-12  ;;  %v64_v30 = vmul.f32 %v156_v24, %v55_v13 }
  0xbd   :  { %v86_v31 = vsel %vm85_vm4, %v75_v12, %v84_v27 }
  0xbe   :  { %v89_v33 = vsel %vm87_vm5, %v88_v29, %v86_v31  ;;  %v66_v34 = vsel %vm65_vm6, %v55_v13, %v64_v30  ;;  %v94_v35 = vmul.f32 %v92_v25, %v90_v28 }
  0xbf   :  { %v93_v36 = vmax.f32 %v89_v33, 1e-12  ;;  %v69_v37 = vsel %vm67_vm7, %v68_v32, %v66_v34 }
  0xc0   :  { %v91_v38 = vmax.f32 %v69_v37, 1e-12  ;;  %157 = vrcp.f32 %v94_v35 }
  0xc2   :  { %v95_v39 = vmul.f32 %v93_v36, %v91_v38 }
  0xc4   :  { %159 = vrcp.f32 %v95_v39 }
  0xcd   :  { %v158_v40 = vpop.eup %157 }
  0xce   :  { %v97_v43 = vmul.f32 %v158_v40, %v47_v41 }
  0xd0   :  { %v112_v46 = vsel %vm111_vm8, %v97_v43, 0.0 }
  0xd1   :  { %v160_v44 = vpop.eup %159 }
  0xd2   :  { %v99_v45 = vmul.f32 %v160_v44, %v49_v42 }
  0xd4   :  { %v113_v47 = vsel %vm111_vm8, %v99_v45, 0.0 }
  0xd5   :  { %v114_v48 = vadd.f32 %v113_v47, %v112_v46 }
  0xd7   :  { %115 = vadd.xlane.f32.xlu0 %v114_v48 }
 0x160   :  { %v116_v49 = vpop.xlane.xlu0 %115 }
 0x161   :  { %v117_v50 = vrot.slane %v116_v49, 4 }
 0x163   :  { %v118_v51 = vadd.f32 %v117_v50, %v116_v49 }
 0x165   :  { %v119_v52 = vrot.slane %v118_v51, 2 }
 0x167   :  { %v120_v53 = vadd.f32 %v119_v52, %v118_v51 }
 0x169   :  { %v121_v54 = vrot.slane %v120_v53, 1 }
 0x16b   :  { %v122_v55 = vadd.f32 %v121_v54, %v120_v53 }
 0x16d   :  { %142 = vpush %v122_v55 }
 0x19e   :  { %s143_s21 = spop %142 }
 0x19f   :  { %v124_v56 = vstv %s143_s21 }
 0x1a0   :  { %125 = vst [vmem:[#allocation7] sm:$0xff] %v124_v56 }
 0x1a1   :  { %212 = shalt.err (!%p209_p0)
}
 0x1a2   :  { %135 = dma.vmem_to_hbm [thread:$0]  %s133_s1, 128, %s258_s2, [#allocation4]  }
 0x1a3   :  { %225 = dma.done.wait [#allocation4], 128  }
 0x1a4   :  { %226 = vsyncadd [#allocation4], 4294967168 }
 0x1a5   :  { %139 = vsyncpa [#allocation3], 1 }
 0x1a6   :  { %140 = vsyncpa [#allocation6], 1 }
 0x1a7   :  { %141 = vsyncpa [#allocation4], 1 }

</bundles_post_ra>
